<compile_context>
chip_gen: v7x
topology: tpu7x:2x2x1
jax: 0.10.0
libtpu: 0.0.40
codegen_flags: <defaults>
</compile_context>

<pallas_src>
import jax
import jax.numpy as jnp
from jax.experimental import pallas as pl
from jax.experimental.pallas import tpu as pltpu

HIDDEN = 128


def _round_up(x, m):
    return ((x + m - 1) // m) * m


def _sublane_multiple(dtype):
    itemsize = jnp.dtype(dtype).itemsize
    return {4: 8, 2: 16, 1: 32}.get(itemsize, 8)


def _choose_tile(B, sub, batch_tile):
    """Batch rows per grid step, rounded to the dtype's sublane multiple."""
    Bq = _round_up(B, sub)
    if batch_tile is not None:
        tile = _round_up(batch_tile, sub)
    else:
        # ~8 steps for very large batches (>= 4 per v7x TensorCore), tile kept
        # in [512, 4096] so per-step overhead is amortized but VMEM (v7x 32 MiB
        # scoped, double-buffered x/out tiles + f32 activations) stays safe.
        tile = min(max(_round_up(max(Bq // 8, 1), sub), 512), 4096)
    return max(sub, min(tile, Bq))


def dqn_mlp_kernel(x_ref, w1_ref, b1_ref, w2_ref, b2_ref, w3_ref, b3_ref, o_ref):
    """Fused 3-layer MLP with ReLU.

    Matmuls run on the MXU in the operands' dtype (f32 or bf16) with f32
    accumulation; bias add and ReLU are done in f32.
    """
    # Layer 1: Linear(in_dim, 128) + ReLU
    h1 = jnp.dot(x_ref[...], w1_ref[...], preferred_element_type=jnp.float32)
    h1 = jnp.maximum(h1 + b1_ref[...], 0.0)

    # Layer 2: Linear(128, 128) + ReLU
    h2 = jnp.dot(h1.astype(w2_ref.dtype), w2_ref[...],
                 preferred_element_type=jnp.float32)
    h2 = jnp.maximum(h2 + b2_ref[...], 0.0)

    # Layer 3: Linear(128, out_dim)  (no activation)
    out = jnp.dot(h2.astype(w3_ref.dtype), w3_ref[...],
                  preferred_element_type=jnp.float32) + b3_ref[...]
    o_ref[...] = out.astype(o_ref.dtype)


def prepare_params(params, compute_dtype=jnp.bfloat16):
    """Cast weights to the MXU operand dtype and biases to f32 row vectors.

    Call once per parameter update and pass the result to
    deep_q_network_forward to hoist the casts out of the forward path.
    """
    f32 = jnp.float32
    return dict(
        w1=params["w1"].astype(compute_dtype),
        b1=params["b1"].astype(f32).reshape(1, -1),
        w2=params["w2"].astype(compute_dtype),
        b2=params["b2"].astype(f32).reshape(1, -1),
        w3=params["w3"].astype(compute_dtype),
        b3=params["b3"].astype(f32).reshape(1, -1),
    )


def deep_q_network_forward(x, params, *, batch_tile=None,
                           compute_dtype=jnp.bfloat16):
    """Run the fused DQN MLP Pallas kernel.

    x:      [B, in_features]
    params: dict with w1 [in,128], b1 [*,128], w2 [128,128], b2 [*,128],
            w3 [128,out], b3 [*,out]   (weights stored [in_features, out_features];
            pass prepare_params(...) output to avoid per-call casts)
    batch_tile:    rows of x per grid step (None -> adaptive 512..4096).
    compute_dtype: MXU operand dtype (default bf16). Accumulation is f32.
    """
    B, in_dim = x.shape
    hidden = params["w1"].shape[1]
    out_dim = params["w3"].shape[1]
    out_dtype = x.dtype
    f32 = jnp.float32

    # Casts / reshapes are no-ops if params came from prepare_params().
    w1 = params["w1"].astype(compute_dtype)
    b1 = params["b1"].astype(f32).reshape(1, hidden)
    w2 = params["w2"].astype(compute_dtype)
    b2 = params["b2"].astype(f32).reshape(1, hidden)
    w3 = params["w3"].astype(compute_dtype)
    b3 = params["b3"].astype(f32).reshape(1, out_dim)

    sub = _sublane_multiple(compute_dtype)
    tile = _choose_tile(B, sub, batch_tile)
    Bp = _round_up(B, tile)
    grid_len = Bp // tile

    xc = x.astype(compute_dtype)
    if Bp != B:
        # Pad only the batch dim (<= tile-1 zero rows); padded rows are sliced
        # off after the kernel and never consumed.
        xc = jnp.pad(xc, ((0, Bp - B), (0, 0)))

    cdt_bytes = jnp.dtype(compute_dtype).itemsize
    flops = 2 * Bp * (in_dim * hidden + hidden * hidden + hidden * out_dim)
    bytes_accessed = (
        Bp * in_dim * cdt_bytes                                  # streamed x
        + (in_dim * hidden + hidden * hidden + hidden * out_dim) * cdt_bytes
        + (2 * hidden + out_dim) * 4                             # f32 biases
        + Bp * out_dim * jnp.dtype(out_dtype).itemsize)          # output

    def const_spec(shape):
        return pl.BlockSpec(shape, lambda i: (0,) * len(shape))

    out = pl.pallas_call(
        dqn_mlp_kernel,
        out_shape=jax.ShapeDtypeStruct((Bp, out_dim), out_dtype),
        grid_spec=pltpu.PrefetchScalarGridSpec(
            num_scalar_prefetch=0,
            grid=(grid_len,),
            in_specs=[
                pl.BlockSpec((tile, in_dim), lambda i: (i, 0)),  # x (streamed)
                const_spec((in_dim, hidden)),    # w1 (VMEM-resident)
                const_spec((1, hidden)),         # b1
                const_spec((hidden, hidden)),    # w2
                const_spec((1, hidden)),         # b2
                const_spec((hidden, out_dim)),   # w3
                const_spec((1, out_dim)),        # b3
            ],
            out_specs=pl.BlockSpec((tile, out_dim), lambda i: (i, 0)),
        ),
        compiler_params=pltpu.CompilerParams(
            dimension_semantics=("parallel",),
        ),
        cost_estimate=pl.CostEstimate(
            flops=flops, transcendentals=0, bytes_accessed=bytes_accessed),
    )(xc, w1, b1, w2, b2, w3, b3)

    if Bp != B:
        out = out[:B]
    return out


def init_params(key, in_dim, out_dim, dtype=jnp.float32):
    """Deterministic init mirroring PyTorch nn.Linear default:
    U(-1/sqrt(fan_in), 1/sqrt(fan_in)) for both weights and biases.
    Weights stored as [in_features, out_features] (transposed vs. PyTorch)."""
    ks = jax.random.split(key, 6)

    def lin(kw, kb, fan_in, fan_out):
        bound = 1.0 / jnp.sqrt(fan_in)
        w = jax.random.uniform(kw, (fan_in, fan_out), dtype, -bound, bound)
        b = jax.random.uniform(kb, (1, fan_out), dtype, -bound, bound)
        return w, b

    w1, b1 = lin(ks[0], ks[1], in_dim, HIDDEN)
    w2, b2 = lin(ks[2], ks[3], HIDDEN, HIDDEN)
    w3, b3 = lin(ks[4], ks[5], HIDDEN, out_dim)
    return dict(w1=w1, b1=b1, w2=w2, b2=b2, w3=w3, b3=b3)


def reference_forward(x, p):
    h1 = jnp.maximum(x @ p["w1"] + p["b1"], 0.0)
    h2 = jnp.maximum(h1 @ p["w2"] + p["b2"], 0.0)
    return h2 @ p["w3"] + p["b3"]


if __name__ == "__main__":
    IN_DIM, OUT_DIM = 16, 4
    key = jax.random.PRNGKey(0)
    k_x, k_p, k_x2 = jax.random.split(key, 3)
    params = init_params(k_p, IN_DIM, OUT_DIM)

    # --- small demo batch, exact f32 compute path ----------------------------
    B = 32
    x = jax.random.normal(k_x, (B, IN_DIM), jnp.float32)
    out = jax.block_until_ready(
        deep_q_network_forward(x, params, compute_dtype=jnp.float32))
    ref = reference_forward(x, params)
    assert out.shape == (B, OUT_DIM)
    assert jnp.allclose(out, ref, atol=1e-5, rtol=1e-5), "f32 mismatch vs reference"

    # --- replay-buffer-sized ragged batch, default bf16 MXU path, hoisted prep
    B2 = 1000  # not a tile multiple -> exercises batch padding / slicing
    x2 = jax.random.normal(k_x2, (B2, IN_DIM), jnp.float32)
    prepped = prepare_params(params, jnp.bfloat16)
    out2 = jax.block_until_ready(deep_q_network_forward(x2, prepped))
    ref2 = reference_forward(x2, params)
    assert out2.shape == (B2, OUT_DIM)
    assert jnp.allclose(out2, ref2, atol=5e-2, rtol=5e-2), "bf16 mismatch vs reference"

    print("KERNEL_OK")
</pallas_src>

<mosaic_0001>
module attributes {stable_mosaic.version = 11 : i64} {
  func.func @dqn_mlp_kernel(%arg0: i32, %arg1: memref<32x16xf32, #tpu.memory_space<vmem>>, %arg2: memref<16x128xf32, #tpu.memory_space<vmem>>, %arg3: memref<1x128xf32, #tpu.memory_space<vmem>>, %arg4: memref<128x128xf32, #tpu.memory_space<vmem>>, %arg5: memref<1x128xf32, #tpu.memory_space<vmem>>, %arg6: memref<128x4xf32, #tpu.memory_space<vmem>>, %arg7: memref<1x4xf32, #tpu.memory_space<vmem>>, %arg8: memref<32x4xf32, #tpu.memory_space<vmem>>) attributes {dimension_semantics = [#tpu.dimension_semantics<parallel>], iteration_bounds = array<i64: 1>, scalar_prefetch = 0 : i64, scratch_operands = 0 : i64, tpu.core_type = #tpu.core_type<tc>, window_params = [{transform_indices = @transform_0, window_bounds = array<i64: 32, 16>}, {pipeline_mode = #tpu.pipeline_mode<synchronous>, transform_indices = @transform_1, window_bounds = array<i64: 16, 128>}, {pipeline_mode = #tpu.pipeline_mode<synchronous>, transform_indices = @transform_2, window_bounds = array<i64: 1, 128>}, {pipeline_mode = #tpu.pipeline_mode<synchronous>, transform_indices = @transform_3, window_bounds = array<i64: 128, 128>}, {pipeline_mode = #tpu.pipeline_mode<synchronous>, transform_indices = @transform_4, window_bounds = array<i64: 1, 128>}, {pipeline_mode = #tpu.pipeline_mode<synchronous>, transform_indices = @transform_5, window_bounds = array<i64: 128, 4>}, {pipeline_mode = #tpu.pipeline_mode<synchronous>, transform_indices = @transform_6, window_bounds = array<i64: 1, 4>}, {transform_indices = @transform_7, window_bounds = array<i64: 32, 4>}]} {
    %c0 = arith.constant 0 : index
    %c0_0 = arith.constant 0 : index
    %0 = vector.load %arg1[%c0, %c0_0] : memref<32x16xf32, #tpu.memory_space<vmem>>, vector<32x16xf32>
    %c0_1 = arith.constant 0 : index
    %c0_2 = arith.constant 0 : index
    %1 = vector.load %arg2[%c0_1, %c0_2] : memref<16x128xf32, #tpu.memory_space<vmem>>, vector<16x128xf32>
    %cst = arith.constant dense<0.000000e+00> : vector<32x128xf32>
    %2 = tpu.matmul %0, %1, %cst {dimension_numbers = #tpu.dot_dimension_numbers<[1], [0], [0], [1], [0, 0, 1, 1], [], []>} : vector<32x16xf32>, vector<16x128xf32>, vector<32x128xf32> -> vector<32x128xf32>
    %c0_3 = arith.constant 0 : index
    %c0_4 = arith.constant 0 : index
    %3 = vector.load %arg3[%c0_3, %c0_4] : memref<1x128xf32, #tpu.memory_space<vmem>>, vector<1x128xf32>
    %4 = vector.broadcast %3 : vector<1x128xf32> to vector<32x128xf32>
    %5 = arith.addf %2, %4 : vector<32x128xf32>
    %cst_5 = arith.constant 0.000000e+00 : f32
    %6 = vector.broadcast %cst_5 : f32 to vector<32x128xf32>
    %7 = arith.maximumf %5, %6 : vector<32x128xf32>
    %c0_6 = arith.constant 0 : index
    %c0_7 = arith.constant 0 : index
    %8 = vector.load %arg4[%c0_6, %c0_7] : memref<128x128xf32, #tpu.memory_space<vmem>>, vector<128x128xf32>
    %cst_8 = arith.constant dense<0.000000e+00> : vector<32x128xf32>
    %9 = tpu.matmul %7, %8, %cst_8 {dimension_numbers = #tpu.dot_dimension_numbers<[1], [0], [0], [1], [0, 0, 1, 1], [], []>} : vector<32x128xf32>, vector<128x128xf32>, vector<32x128xf32> -> vector<32x128xf32>
    %c0_9 = arith.constant 0 : index
    %c0_10 = arith.constant 0 : index
    %10 = vector.load %arg5[%c0_9, %c0_10] : memref<1x128xf32, #tpu.memory_space<vmem>>, vector<1x128xf32>
    %11 = vector.broadcast %10 : vector<1x128xf32> to vector<32x128xf32>
    %12 = arith.addf %9, %11 : vector<32x128xf32>
    %cst_11 = arith.constant 0.000000e+00 : f32
    %13 = vector.broadcast %cst_11 : f32 to vector<32x128xf32>
    %14 = arith.maximumf %12, %13 : vector<32x128xf32>
    %c0_12 = arith.constant 0 : index
    %c0_13 = arith.constant 0 : index
    %15 = vector.load %arg6[%c0_12, %c0_13] : memref<128x4xf32, #tpu.memory_space<vmem>>, vector<128x4xf32>
    %cst_14 = arith.constant dense<0.000000e+00> : vector<32x4xf32>
    %16 = tpu.matmul %14, %15, %cst_14 {dimension_numbers = #tpu.dot_dimension_numbers<[1], [0], [0], [1], [0, 0, 1, 1], [], []>} : vector<32x128xf32>, vector<128x4xf32>, vector<32x4xf32> -> vector<32x4xf32>
    %c0_15 = arith.constant 0 : index
    %c0_16 = arith.constant 0 : index
    %17 = vector.load %arg7[%c0_15, %c0_16] : memref<1x4xf32, #tpu.memory_space<vmem>>, vector<1x4xf32>
    %18 = vector.broadcast %17 : vector<1x4xf32> to vector<32x4xf32>
    %19 = arith.addf %16, %18 : vector<32x4xf32>
    %c0_17 = arith.constant 0 : index
    %c0_18 = arith.constant 0 : index
    %20 = vector.load %arg8[%c0_17, %c0_18] : memref<32x4xf32, #tpu.memory_space<vmem>>, vector<32x4xf32>
    tpu.vector_store %arg8[%c0_17, %c0_18], %19 {strides = array<i32>} : memref<32x4xf32, #tpu.memory_space<vmem>>, vector<32x4xf32>,
    return
  }
  func.func @transform_0(%arg0: i32) -> (i32, i32) {
    %c0_i32 = arith.constant 0 : i32
    %c0_i32_0 = arith.constant 0 : i32
    return %arg0, %c0_i32 : i32, i32
  }
  func.func @transform_1(%arg0: i32) -> (i32, i32) {
    %c0_i32 = arith.constant 0 : i32
    %c0_i32_0 = arith.constant 0 : i32
    %c0_i32_1 = arith.constant 0 : i32
    return %c0_i32, %c0_i32_0 : i32, i32
  }
  func.func @transform_2(%arg0: i32) -> (i32, i32) {
    %c0_i32 = arith.constant 0 : i32
    %c0_i32_0 = arith.constant 0 : i32
    %c0_i32_1 = arith.constant 0 : i32
    return %c0_i32, %c0_i32_0 : i32, i32
  }
  func.func @transform_3(%arg0: i32) -> (i32, i32) {
    %c0_i32 = arith.constant 0 : i32
    %c0_i32_0 = arith.constant 0 : i32
    %c0_i32_1 = arith.constant 0 : i32
    return %c0_i32, %c0_i32_0 : i32, i32
  }
  func.func @transform_4(%arg0: i32) -> (i32, i32) {
    %c0_i32 = arith.constant 0 : i32
    %c0_i32_0 = arith.constant 0 : i32
    %c0_i32_1 = arith.constant 0 : i32
    return %c0_i32, %c0_i32_0 : i32, i32
  }
  func.func @transform_5(%arg0: i32) -> (i32, i32) {
    %c0_i32 = arith.constant 0 : i32
    %c0_i32_0 = arith.constant 0 : i32
    %c0_i32_1 = arith.constant 0 : i32
    return %c0_i32, %c0_i32_0 : i32, i32
  }
  func.func @transform_6(%arg0: i32) -> (i32, i32) {
    %c0_i32 = arith.constant 0 : i32
    %c0_i32_0 = arith.constant 0 : i32
    %c0_i32_1 = arith.constant 0 : i32
    return %c0_i32, %c0_i32_0 : i32, i32
  }
  func.func @transform_7(%arg0: i32) -> (i32, i32) {
    %c0_i32 = arith.constant 0 : i32
    %c0_i32_0 = arith.constant 0 : i32
    return %arg0, %c0_i32 : i32, i32
  }
}

</mosaic_0001>

<bundles_post_ra>
// kernel: tpu_custom_call.1
= control target key start
LH: loop header
LB: loop body
LE: loop exit
PB: predicated region body
PF: predicated region fallthrough
CT: control target
= control target key end

     0   :  { %vm39_vm0 = vcmask 130048   ;;  %vm361_vm1 = vcmask 31744   ;;  %s756_s1 = inlined_call_operand.vmem [shape: f32[16,128], index: 1, kind: input, shape index: {}]   ;;  %s757_s0 = inlined_call_operand.vmem [shape: f32[32,16], index: 0, kind: input, shape index: {}]   ;;  %s758_s3 = inlined_call_operand.vmem [shape: f32[128,128], index: 3, kind: input, shape index: {}]   ;;  %s759_s5 = inlined_call_operand.vmem [shape: f32[128,4], index: 5, kind: input, shape index: {}]   ;;  %s760_s2 = inlined_call_operand.vmem [shape: f32[1,128], index: 2, kind: input, shape index: {}]   ;;  %s761_s4 = inlined_call_operand.vmem [shape: f32[1,128], index: 4, kind: input, shape index: {}]   ;;  %s762_s6 = inlined_call_operand.vmem [shape: f32[1,4], index: 6, kind: input, shape index: {}]   ;;  %s763_s7 = inlined_call_operand.vmem [shape: f32[32,4], index: 7, kind: output, shape index: {}]  }
   0x1   :  { %v30_v0 = vld [vmem:[%s756_s1] sm:$0xff]  ;;  %v31_v1 = vld [vmem:[%s756_s1 + $0x8] sm:$0xff]  ;;  %v143_v6 = vld [vmem:[%s758_s3 + $0x10] sm:$0xff] }
   0x2   :  { %v26_v2 = vld [vmem:[%s757_s0] sm:$0xff]  ;;  %v509_v3 = vpack.c.bf16 %v31_v1, %v30_v0  ;;  %v142_v5 = vld [vmem:[%s758_s3 + $0x8] sm:$0xff]  ;;  %v144_v8 = vld [vmem:[%s758_s3 + $0x18] sm:$0xff] }
   0x3   :  { %427 = vmatprep.mubr.msk.f32.mxu0 %vm39_vm0, %v26_v2  ;;  %v141_v4 = vld [vmem:[%s758_s3] sm:$0xff]  ;;  %v27_v9 = vld [vmem:[%s757_s0 + $0x8] sm:$0xff]  ;;  %v517_v10 = vpack.c.bf16 %v144_v8, %v143_v6  ;;  %v28_v13 = vld [vmem:[%s757_s0 + $0x10] sm:$0xff] }
   0x4   :  { %510 = vmatprep.subr.bf16.mxu0 %v509_v3  ;;  %v513_v7 = vpack.c.bf16 %v142_v5, %v141_v4  ;;  %v145_v11 = vld [vmem:[%s758_s3 + $0x20] sm:$0xff]  ;;  %v146_v12 = vld [vmem:[%s758_s3 + $0x28] sm:$0xff]  ;;  %v29_v15 = vld [vmem:[%s757_s0 + $0x18] sm:$0xff] }
   0x5   :  { %512 = vmatpush3.bf16.msra.mxu0 %v509_v3  ;;  %v521_v14 = vpack.c.bf16 %v146_v12, %v145_v11  ;;  %v147_v16 = vld [vmem:[%s758_s3 + $0x30] sm:$0xff]  ;;  %v148_v17 = vld [vmem:[%s758_s3 + $0x38] sm:$0xff]  ;;  %v149_v19 = vld [vmem:[%s758_s3 + $0x40] sm:$0xff] }
   0x6   :  { %514 = vmatprep.subr.bf16.mxu1 %v513_v7  ;;  %v525_v18 = vpack.c.bf16 %v148_v17, %v147_v16  ;;  %v150_v20 = vld [vmem:[%s758_s3 + $0x48] sm:$0xff]  ;;  %v151_v22 = vld [vmem:[%s758_s3 + $0x50] sm:$0xff]  ;;  %v152_v23 = vld [vmem:[%s758_s3 + $0x58] sm:$0xff] }
   0x7   :  { %516 = vmatpush3.bf16.msra.mxu1 %v513_v7  ;;  %v529_v21 = vpack.c.bf16 %v150_v20, %v149_v19  ;;  %v533_v24 = vpack.c.bf16 %v152_v23, %v151_v22  ;;  %v153_v25 = vld [vmem:[%s758_s3 + $0x60] sm:$0xff]  ;;  %v154_v26 = vld [vmem:[%s758_s3 + $0x68] sm:$0xff]  ;;  %v155_v28 = vld [vmem:[%s758_s3 + $0x70] sm:$0xff] }
   0x8   :  { %428 = vmatmul.mubr.msk.f32.vlgmr.msra.gmra.mrb[0].mxu0 %vm39_vm0, %v27_v9  ;;  %518 = vmatprep.subr.bf16.mxu1 %v517_v10  ;;  %v537_v27 = vpack.c.bf16 %v154_v26, %v153_v25  ;;  %v156_v29 = vld [vmem:[%s758_s3 + $0x78] sm:$0xff]  ;;  %v253_v31 = vld [vmem:[%s759_s5] sm:$0xff]  ;;  %v254_v32 = vld [vmem:[%s759_s5 + $0x8] sm:$0xff] }
   0x9   :  { %430 = vmatprep.mubr.msk.f32.mxu0 %vm39_vm0, %v28_v13  ;;  %v541_v30 = vpack.c.bf16 %v156_v29, %v155_v28  ;;  %v255_v33 = vld [vmem:[%s759_s5 + $0x10] sm:$0xff]  ;;  %v545_v34 = vpack.c.bf16 %v254_v32, %v253_v31  ;;  %v256_v35 = vld [vmem:[%s759_s5 + $0x18] sm:$0xff]  ;;  %v257_v37 = vld [vmem:[%s759_s5 + $0x20] sm:$0xff] }
   0xa   :  { %v549_v36 = vpack.c.bf16 %v256_v35, %v255_v33  ;;  %v258_v38 = vld [vmem:[%s759_s5 + $0x28] sm:$0xff]  ;;  %v259_v40 = vld [vmem:[%s759_s5 + $0x30] sm:$0xff]  ;;  %v260_v41 = vld [vmem:[%s759_s5 + $0x38] sm:$0xff] }
   0xb   :  { %520 = vmatpush3.bf16.msra.mxu1 %v517_v10  ;;  %546 = vmatprep.subr.bf16.mxu0 %v545_v34  ;;  %v553_v39 = vpack.c.bf16 %v258_v38, %v257_v37  ;;  %v557_v42 = vpack.c.bf16 %v260_v41, %v259_v40  ;;  %v261_v43 = vld [vmem:[%s759_s5 + $0x40] sm:$0xff]  ;;  %v262_v44 = vld [vmem:[%s759_s5 + $0x48] sm:$0xff]  ;;  %v263_v46 = vld [vmem:[%s759_s5 + $0x50] sm:$0xff] }
   0xc   :  { %431 = vmatmul.mubr.msk.f32.gmra.mrb[2].mxu0 %vm39_vm0, %v29_v15  ;;  %522 = vmatprep.subr.bf16.mxu1 %v521_v14  ;;  %v561_v45 = vpack.c.bf16 %v262_v44, %v261_v43  ;;  %v264_v47 = vld [vmem:[%s759_s5 + $0x58] sm:$0xff]  ;;  %v265_v49 = vld [vmem:[%s759_s5 + $0x60] sm:$0xff]  ;;  %v266_v50 = vld [vmem:[%s759_s5 + $0x68] sm:$0xff] }
   0xd   :  { %548 = vmatpush3.bf16.msra.mxu0 %v545_v34  ;;  %v565_v48 = vpack.c.bf16 %v264_v47, %v263_v46  ;;  %v569_v51 = vpack.c.bf16 %v266_v50, %v265_v49  ;;  %v370_v52 = vld [vmem:[%s760_s2] ss:$0 sm:$0xff]  ;;  %v267_v1 = vld [vmem:[%s759_s5 + $0x70] sm:$0xff]  ;;  %v268_v2 = vld [vmem:[%s759_s5 + $0x78] sm:$0xff] }
   0xe   :  { %550 = vmatprep.subr.bf16.mxu0 %v549_v36  ;;  %v573_v3 = vpack.c.bf16 %v268_v2, %v267_v1  ;;  %v375_v4 = vld [vmem:[%s761_s4] ss:$0 sm:$0xff] }
   0xf   :  { %524 = vmatpush3.bf16.msra.mxu1 %v521_v14  ;;  %v376_v17 = vld [vmem:[%s762_s6] ss:$0 sm:$0xff] }
  0x10   :  { %526 = vmatprep.subr.bf16.mxu1 %v525_v18 }
  0x11   :  { %552 = vmatpush3.bf16.msra.mxu0 %v549_v36 }
  0x12   :  { %554 = vmatprep.subr.bf16.mxu0 %v553_v39 }
  0x13   :  { %528 = vmatpush3.bf16.msra.mxu1 %v525_v18 }
  0x14   :  { %530 = vmatprep.subr.bf16.mxu1 %v529_v21 }
  0x15   :  { %556 = vmatpush3.bf16.msra.mxu0 %v553_v39 }
  0x16   :  { %558 = vmatprep.subr.bf16.mxu0 %v557_v42 }
  0x17   :  { %532 = vmatpush3.bf16.msra.mxu1 %v529_v21 }
  0x18   :  { %534 = vmatprep.subr.bf16.mxu1 %v533_v24 }
  0x19   :  { %560 = vmatpush3.bf16.msra.mxu0 %v557_v42 }
  0x1a   :  { %562 = vmatprep.subr.bf16.mxu0 %v561_v45 }
  0x1b   :  { %536 = vmatpush3.bf16.msra.mxu1 %v533_v24 }
  0x1c   :  { %538 = vmatprep.subr.bf16.mxu1 %v537_v27 }
  0x1d   :  { %564 = vmatpush3.bf16.msra.mxu0 %v561_v45 }
  0x1e   :  { %566 = vmatprep.subr.bf16.mxu0 %v565_v48 }
  0x1f   :  { %540 = vmatpush3.bf16.msra.mxu1 %v537_v27 }
  0x20   :  { %542 = vmatprep.subr.bf16.mxu1 %v541_v30 }
  0x21   :  { %568 = vmatpush3.bf16.msra.mxu0 %v565_v48 }
  0x22   :  { %570 = vmatprep.subr.bf16.mxu0 %v569_v51 }
  0x23   :  { %544 = vmatpush3.bf16.msra.mxu1 %v541_v30 }
  0x25   :  { %572 = vmatpush3.bf16.msra.mxu0 %v569_v51 }
  0x26   :  { %574 = vmatprep.subr.bf16.mxu0 %v573_v3 }
  0x29   :  { %576 = vmatpush3.bf16.msra.mxu0 %v573_v3 }
  0xdb   :  { %v429_v53 = vpop.f32.mrb[0].mxu0 }
  0xdc   :  { %v124_v54 = vadd.f32 %v429_v53, %v370_v52  ;;  %v118_v55 = vpop.f32.mrb[1].mxu0 }
  0xdd   :  { %v119_v56 = vadd.f32 %v370_v52, %v118_v55 }
  0xde   :  { %v138_v59 = vmax.f32 %v124_v54, 0.0 }
  0xdf   :  { %v432_v57 = vpop.f32.mrb[2].mxu0  ;;  %v137_v58 = vmax.f32 %v119_v56, 0.0 }
  0xe0   :  { %v134_v60 = vadd.f32 %v432_v57, %v370_v52  ;;  %v128_v61 = vpop.f32.mrb[3].mxu0 }
  0xe1   :  { %v129_v62 = vadd.f32 %v370_v52, %v128_v61  ;;  %465 = vmatprep.mubr.f32.mxu1 %v137_v58 }
  0xe2   :  { %466 = vmatmul.mubr.f32.vlgmr.msra.gmra.mrb[0].mxu1 %v138_v59  ;;  %v140_v0 = vmax.f32 %v134_v60, 0.0 }
  0xe3   :  { %v139_v63 = vmax.f32 %v129_v62, 0.0 }
  0xe5   :  { %468 = vmatprep.mubr.f32.mxu1 %v139_v63 }
  0xe6   :  { %469 = vmatmul.mubr.f32.gmra.mrb[2].mxu1 %v140_v0 }
 0x1b5   :  { %v467_v5 = vpop.f32.mrb[0].mxu1 }
 0x1b6   :  { %v236_v6 = vadd.f32 %v467_v5, %v375_v4  ;;  %v230_v7 = vpop.f32.mrb[1].mxu1 }
 0x1b7   :  { %v231_v8 = vadd.f32 %v375_v4, %v230_v7 }
 0x1b8   :  { %v250_v11 = vmax.f32 %v236_v6, 0.0 }
 0x1b9   :  { %v249_v9 = vmax.f32 %v231_v8, 0.0  ;;  %v470_v10 = vpop.f32.mrb[2].mxu1 }
 0x1ba   :  { %v246_v12 = vadd.f32 %v470_v10, %v375_v4  ;;  %v240_v13 = vpop.f32.mrb[3].mxu1 }
 0x1bb   :  { %v241_v14 = vadd.f32 %v375_v4, %v240_v13  ;;  %503 = vmatprep.mubr.f32.mxu0 %v249_v9 }
 0x1bc   :  { %504 = vmatmul.mubr.f32.vlgmr.msra.gmra.mrb[4].mxu0 %v250_v11  ;;  %v252_v16 = vmax.f32 %v246_v12, 0.0 }
 0x1bd   :  { %v251_v15 = vmax.f32 %v241_v14, 0.0 }
 0x1bf   :  { %506 = vmatprep.mubr.f32.mxu0 %v251_v15 }
 0x1c0   :  { %507 = vmatmul.mubr.f32.gmra.mrb[6].mxu0 %v252_v16 }
 0x28f   :  { %v505_v18 = vpop.f32.mrb[4].mxu0 }
 0x290   :  { %v348_v19 = vadd.f32 %v505_v18, %v376_v17  ;;  %v342_v20 = vpop.f32.mrb[5].mxu0 }
 0x291   :  { %v343_v21 = vadd.f32 %v376_v17, %v342_v20 }
 0x292   :  { %363 = vst.msk [vmem:[%s763_s7 + $0x8] sm:$0xff] %vm361_vm1, %v348_v19 }
 0x293   :  { %362 = vst.msk [vmem:[%s763_s7] sm:$0xff] %vm361_vm1, %v343_v21  ;;  %v508_v22 = vpop.f32.mrb[6].mxu0 }
 0x294   :  { %v358_v23 = vadd.f32 %v508_v22, %v376_v17  ;;  %v352_v24 = vpop.f32.mrb[7].mxu0 }
 0x295   :  { %v353_v25 = vadd.f32 %v376_v17, %v352_v24 }
 0x296   :  { %365 = vst.msk [vmem:[%s763_s7 + $0x18] sm:$0xff] %vm361_vm1, %v358_v23 }
 0x297   :  { %364 = vst.msk [vmem:[%s763_s7 + $0x10] sm:$0xff] %vm361_vm1, %v353_v25 }

</bundles_post_ra>
